<compile_context>
chip_gen: v7x
topology: tpu7x:2x2x1
jax: 0.10.0
libtpu: 0.0.40
codegen_flags: <defaults>
</compile_context>

<pallas_src>
import jax
import jax.numpy as jnp
import numpy as np
from jax.experimental import pallas as pl
from jax.experimental.pallas import tpu as pltpu

# ----------------------------- configuration --------------------------------
WIDTH = 2          # context width (width+1 taps per direction)
INPUT_SIZE = 32    # must equal HIDDEN_SIZE (required by the reference module)
HIDDEN_SIZE = 32
N_LAYERS = 2
N_HIGHWAY = 2
BATCH = 2
SEQ = 8


# ------------------------------- the kernel ---------------------------------
def _bilm_kernel_factory(S, H, W, n_layers, n_highway):
    """Build the kernel for a given static configuration."""

    def kernel(x_ref, conv_w_ref, hw_w_ref, hw_b_ref, out_ref):
        M = x_ref.shape[0]                 # Bblk * S rows (batches stacked on sublanes)
        H2 = 2 * H
        KDIR = conv_w_ref.shape[1] // 2    # per-direction padded contraction (128)
        PAD = KDIR - (W + 1) * H           # zero-lane pad per direction (32)

        x = x_ref[...]                                    # (M, H)
        cur = jnp.concatenate([x, x], axis=-1)            # packed [fwd | bwd], (M, 2H)

        # Hoisted per-tap validity masks (row index within each stacked batch);
        # reused by every layer.
        row = jax.lax.broadcasted_iota(jnp.int32, (M, 1), 0) % S
        fmask = [row >= o for o in range(1, W + 1)]       # fwd tap o valid rows
        bmask = [row < (S - o) for o in range(1, W + 1)]  # bwd tap o valid rows
        zrow = jnp.zeros((W, H), jnp.float32)             # sublane pad for shifts
        zlane = [jnp.zeros((M, PAD), jnp.float32)] if PAD > 0 else []

        for layer in range(n_layers):
            cache = cur
            f_seq = cur[:, :H]
            b_seq = cur[:, H:]

            # Shifted taps: zero-pad + static sublane slice, then mask the rows
            # that would otherwise leak data across the stacked batches.
            pf = jnp.concatenate([zrow, f_seq], axis=0)   # (M+W, H)
            pb = jnp.concatenate([b_seq, zrow], axis=0)   # (M+W, H)
            f_taps = [f_seq] + [
                jnp.where(fmask[o - 1], pf[W - o:W - o + M, :], 0.0)
                for o in range(1, W + 1)]
            b_taps = [b_seq] + [
                jnp.where(bmask[o - 1], pb[o:o + M, :], 0.0)
                for o in range(1, W + 1)]
            # Lane layout: [f0 f1 f2 Z | b0 b1 b2 Z]  ->  (M, 2*KDIR) = (M, 256)
            ctx = jnp.concatenate(f_taps + zlane + b_taps + zlane, axis=-1)

            # Both directions' causal "convs" as ONE matmul (block-diag weights).
            cur = jnp.maximum(
                jnp.dot(ctx, conv_w_ref[layer],
                        preferred_element_type=jnp.float32), 0.0)
            # dropout(p=0.0) -> identity

            # Highway: fused [nonlinear | gate] for both directions, one matmul.
            for j in range(n_highway):
                p = jnp.dot(cur, hw_w_ref[layer, j],
                            preferred_element_type=jnp.float32) + hw_b_ref[layer, j]
                nl = jnp.maximum(p[:, :H2], 0.0)
                g = jax.nn.sigmoid(p[:, H2:])
                cur = nl + g * (cur - nl)     # == g*cur + (1-g)*relu(nl)

            if layer != 0:                    # residual skip only for layer != 0
                cur = cur + cache

            out_ref[layer] = cur              # (M, 2H) = [fwd | bwd] for this layer

    return kernel


# ------------------------------ JAX wrapper ----------------------------------
def _pick_batch_split(B):
    """Grid steps along batch: 1 on single-TC chips (v5e/v6e, avoid per-step
    pipeline overhead), 2 on dual-TC v7x so both TensorCores get work."""
    kind = ""
    try:
        kind = jax.devices()[0].device_kind.lower()
    except Exception:
        pass
    if ("v7" in kind or "7x" in kind) and B % 2 == 0:
        return 2
    return 1


@jax.jit
def bengio03_highway_bilm_v2(inputs, mask, params):
    """inputs: (B, S, H) f32; mask is unused by the reference forward."""
    del mask  # the PyTorch forward never uses it
    B, S, H = inputs.shape
    L, W1, H_in, H_out = params["fw_conv"].shape
    NH = params["f_hn_w"].shape[1]
    W = W1 - 1
    assert H == H_in == H_out, "module requires input_size == hidden_size"
    H2 = 2 * H
    KTAP = W1 * H
    KDIR = ((KTAP + 127) // 128) * 128        # pad per-direction contraction to 128

    # ---- pack weights (trace-time layout plumbing) --------------------------
    # Conv: taps stacked along K, directions block-diagonal, K zero-padded.
    conv_w = jnp.zeros((L, 2 * KDIR, H2), jnp.float32)
    conv_w = conv_w.at[:, :KTAP, :H].set(params["fw_conv"].reshape(L, KTAP, H))
    conv_w = conv_w.at[:, KDIR:KDIR + KTAP, H:].set(params["bw_conv"].reshape(L, KTAP, H))

    # Highway: [ blockdiag(f_nl, b_nl) | blockdiag(f_gate, b_gate) ] -> (L,NH,2H,4H)
    zH = jnp.zeros((L, NH, H, H), jnp.float32)
    nl_bd = jnp.concatenate(
        [jnp.concatenate([params["f_hn_w"], zH], -1),
         jnp.concatenate([zH, params["b_hn_w"]], -1)], -2)
    g_bd = jnp.concatenate(
        [jnp.concatenate([params["f_hg_w"], zH], -1),
         jnp.concatenate([zH, params["b_hg_w"]], -1)], -2)
    hw_w = jnp.concatenate([nl_bd, g_bd], axis=-1)                       # (L,NH,2H,4H)
    hw_b = jnp.concatenate([params["f_hn_b"], params["b_hn_b"],
                            params["f_hg_b"], params["b_hg_b"]], -1)[:, :, None, :]

    nsteps = _pick_batch_split(B)
    Bblk = B // nsteps
    Mblk = Bblk * S

    x = inputs.astype(jnp.float32).reshape(B * S, H)   # free (row-major) reshape

    kernel = _bilm_kernel_factory(S, H, W, L, NH)
    const3 = lambda b: (0, 0, 0)
    const4 = lambda b: (0, 0, 0, 0)
    out = pl.pallas_call(
        kernel,
        out_shape=jax.ShapeDtypeStruct((L, B * S, H2), jnp.float32),
        grid=(nsteps,),
        in_specs=[
            pl.BlockSpec((Mblk, H), lambda b: (b, 0)),          # per-step batch rows
            pl.BlockSpec((L, 2 * KDIR, H2), const3),            # weights: VMEM resident
            pl.BlockSpec((L, NH, H2, 2 * H2), const4),
            pl.BlockSpec((L, NH, 1, 2 * H2), const4),
        ],
        out_specs=pl.BlockSpec((L, Mblk, H2), lambda b: (0, b, 0)),
        compiler_params=pltpu.CompilerParams(
            dimension_semantics=("parallel",)),                 # v7x: 2 TCs
    )(x, conv_w, hw_w, hw_b)

    # Free row-major reshape; already in the module's (L, B, S, 2H) layout.
    return out.reshape(L, B, S, H2)


# --------------------------- pure-JAX reference -------------------------------
def _reference(inputs, params):
    B, S, H = inputs.shape
    x = inputs.astype(jnp.float32)

    def mm(a, w):
        return jnp.einsum("bsh,hk->bsk", a, w)

    def shift_fwd(a, o):
        if o == 0:
            return a
        return jnp.concatenate([jnp.zeros((B, o, H), jnp.float32), a[:, : S - o, :]], 1)

    def shift_bwd(a, o):
        if o == 0:
            return a
        return jnp.concatenate([a[:, o:, :], jnp.zeros((B, o, H), jnp.float32)], 1)

    outs = []
    f_seq, b_seq = x, x
    for layer in range(N_LAYERS):
        f_cache, b_cache = f_seq, b_seq
        nf = sum(mm(shift_fwd(f_seq, o), params["fw_conv"][layer, o]) for o in range(WIDTH + 1))
        nb = sum(mm(shift_bwd(b_seq, o), params["bw_conv"][layer, o]) for o in range(WIDTH + 1))
        cf, cb = jnp.maximum(nf, 0.0), jnp.maximum(nb, 0.0)
        for j in range(N_HIGHWAY):
            nlf = jnp.maximum(mm(cf, params["f_hn_w"][layer, j]) + params["f_hn_b"][layer, j], 0.0)
            gtf = jax.nn.sigmoid(mm(cf, params["f_hg_w"][layer, j]) + params["f_hg_b"][layer, j])
            cf = gtf * cf + (1.0 - gtf) * nlf
            nlb = jnp.maximum(mm(cb, params["b_hn_w"][layer, j]) + params["b_hn_b"][layer, j], 0.0)
            gtb = jax.nn.sigmoid(mm(cb, params["b_hg_w"][layer, j]) + params["b_hg_b"][layer, j])
            cb = gtb * cb + (1.0 - gtb) * nlb
        if layer != 0:
            cf, cb = cf + f_cache, cb + b_cache
        outs.append(jnp.concatenate([cf, cb], axis=-1))
        f_seq, b_seq = cf, cb
    return jnp.stack(outs, axis=0)


# --------------------------- parameter construction ---------------------------
def make_params(key):
    H, L, NH, W1 = HIDDEN_SIZE, N_LAYERS, N_HIGHWAY, WIDTH + 1
    ks = jax.random.split(key, 8)
    scale = 1.0 / np.sqrt(H)
    # Conv (Linear, no bias) weights stored as (in, out) so y = x @ W.
    fw_conv = jax.random.normal(ks[0], (L, W1, H, H), jnp.float32) * scale
    bw_conv = jax.random.normal(ks[1], (L, W1, H, H), jnp.float32) * scale
    # Highway Linear(H, 2H) split into nonlinear / gate halves, (in, out) layout.
    f_hn_w = jax.random.normal(ks[2], (L, NH, H, H), jnp.float32) * scale
    f_hg_w = jax.random.normal(ks[3], (L, NH, H, H), jnp.float32) * scale
    b_hn_w = jax.random.normal(ks[4], (L, NH, H, H), jnp.float32) * scale
    b_hg_w = jax.random.normal(ks[5], (L, NH, H, H), jnp.float32) * scale
    f_hn_b = jax.random.normal(ks[6], (L, NH, H), jnp.float32) * 0.1
    b_hn_b = jax.random.normal(ks[7], (L, NH, H), jnp.float32) * 0.1
    f_hg_b = jnp.ones((L, NH, H), jnp.float32)   # AllenNLP-style gate bias init
    b_hg_b = jnp.ones((L, NH, H), jnp.float32)
    return dict(fw_conv=fw_conv, bw_conv=bw_conv,
                f_hn_w=f_hn_w, f_hg_w=f_hg_w, f_hn_b=f_hn_b, f_hg_b=f_hg_b,
                b_hn_w=b_hn_w, b_hg_w=b_hg_w, b_hn_b=b_hn_b, b_hg_b=b_hg_b)


# ----------------------------------- main -------------------------------------
if __name__ == "__main__":
    key = jax.random.PRNGKey(0)
    k_x, k_p = jax.random.split(key)
    inputs = jax.random.normal(k_x, (BATCH, SEQ, INPUT_SIZE), jnp.float32)
    mask = jnp.ones((BATCH, SEQ), jnp.int32)   # unused (matches reference forward)
    params = make_params(k_p)

    out = jax.block_until_ready(bengio03_highway_bilm_v2(inputs, mask, params))

    expected_shape = (N_LAYERS, BATCH, SEQ, 2 * HIDDEN_SIZE)
    assert out.shape == expected_shape, (out.shape, expected_shape)

    ref = jax.block_until_ready(_reference(inputs, params))
    max_err = float(np.max(np.abs(np.asarray(out) - np.asarray(ref))))
    assert np.allclose(np.asarray(out), np.asarray(ref), atol=1e-4, rtol=1e-4), max_err

    print("KERNEL_OK")
</pallas_src>

<mosaic_0001>
module attributes {stable_mosaic.version = 11 : i64} {
  func.func @kernel(%arg0: i32, %arg1: memref<16x32xf32, #tpu.memory_space<vmem>>, %arg2: memref<2x256x64xf32, #tpu.memory_space<vmem>>, %arg3: memref<2x2x64x128xf32, #tpu.memory_space<vmem>>, %arg4: memref<2x2x1x128xf32, #tpu.memory_space<vmem>>, %arg5: memref<2x16x64xf32, #tpu.memory_space<vmem>>) attributes {dimension_semantics = [#tpu.dimension_semantics<parallel>], iteration_bounds = array<i64: 1>, scalar_prefetch = 0 : i64, scratch_operands = 0 : i64, tpu.core_type = #tpu.core_type<tc>, window_params = [{transform_indices = @transform_0, window_bounds = array<i64: 16, 32>}, {pipeline_mode = #tpu.pipeline_mode<synchronous>, transform_indices = @transform_1, window_bounds = array<i64: 2, 256, 64>}, {pipeline_mode = #tpu.pipeline_mode<synchronous>, transform_indices = @transform_2, window_bounds = array<i64: 2, 2, 64, 128>}, {pipeline_mode = #tpu.pipeline_mode<synchronous>, transform_indices = @transform_3, window_bounds = array<i64: 2, 2, 1, 128>}, {transform_indices = @transform_4, window_bounds = array<i64: 2, 16, 64>}]} {
    %c0 = arith.constant 0 : index
    %c0_0 = arith.constant 0 : index
    %0 = vector.load %arg1[%c0, %c0_0] : memref<16x32xf32, #tpu.memory_space<vmem>>, vector<16x32xf32>
    %1 = tpu.concatenate %0, %0 in 1 : vector<16x32xf32>, vector<16x32xf32> -> vector<16x64xf32>
    %2 = tpu.iota {dimensions = array<i32: 0>} : vector<16x1xi32>
    %c8_i32 = arith.constant 8 : i32
    %c0_i32 = arith.constant 0 : i32
    %3 = arith.cmpi eq, %c8_i32, %c0_i32 : i32
    %c1_i32 = arith.constant 1 : i32
    %4 = arith.select %3, %c1_i32, %c8_i32 : i32
    %5 = vector.broadcast %4 : i32 to vector<16x1xi32>
    %6 = arith.remsi %2, %5 : vector<16x1xi32>
    %c0_i32_1 = arith.constant 0 : i32
    %7 = vector.broadcast %c0_i32_1 : i32 to vector<16x1xi32>
    %8 = arith.cmpi ne, %6, %7 : vector<16x1xi32>
    %c0_i32_2 = arith.constant 0 : i32
    %9 = vector.broadcast %c0_i32_2 : i32 to vector<16x1xi32>
    %10 = arith.cmpi slt, %6, %9 : vector<16x1xi32>
    %c0_i32_3 = arith.constant 0 : i32
    %11 = arith.cmpi slt, %4, %c0_i32_3 : i32
    %12 = vector.broadcast %11 : i1 to vector<16x1xi1>
    %13 = vector.broadcast %12 : vector<16x1xi1> to vector<16x1xi1>
    %14 = arith.xori %10, %13 : vector<16x1xi1>
    %15 = arith.andi %14, %8 : vector<16x1xi1>
    %16 = vector.broadcast %4 : i32 to vector<16x1xi32>
    %17 = arith.addi %6, %16 : vector<16x1xi32>
    %18 = arith.select %15, %17, %6 : vector<16x1xi1>, vector<16x1xi32>
    %c1_i32_4 = arith.constant 1 : i32
    %19 = vector.broadcast %c1_i32_4 : i32 to vector<16x1xi32>
    %20 = arith.cmpi sge, %18, %19 : vector<16x1xi32>
    %c2_i32 = arith.constant 2 : i32
    %21 = vector.broadcast %c2_i32 : i32 to vector<16x1xi32>
    %22 = arith.cmpi sge, %18, %21 : vector<16x1xi32>
    %c7_i32 = arith.constant 7 : i32
    %23 = vector.broadcast %c7_i32 : i32 to vector<16x1xi32>
    %24 = arith.cmpi slt, %18, %23 : vector<16x1xi32>
    %c6_i32 = arith.constant 6 : i32
    %25 = vector.broadcast %c6_i32 : i32 to vector<16x1xi32>
    %26 = arith.cmpi slt, %18, %25 : vector<16x1xi32>
    %cst = arith.constant 0.000000e+00 : f32
    %27 = vector.broadcast %cst : f32 to vector<2x32xf32>
    %cst_5 = arith.constant 0.000000e+00 : f32
    %28 = vector.broadcast %cst_5 : f32 to vector<16x32xf32>
    %29 = vector.extract_strided_slice %1 {offsets = [0, 0], sizes = [16, 32], strides = [1, 1]} : vector<16x64xf32> to vector<16x32xf32>
    %30 = vector.extract_strided_slice %1 {offsets = [0, 32], sizes = [16, 32], strides = [1, 1]} : vector<16x64xf32> to vector<16x32xf32>
    %31 = tpu.concatenate %27, %29 in 0 : vector<2x32xf32>, vector<16x32xf32> -> vector<18x32xf32>
    %32 = tpu.concatenate %30, %27 in 0 : vector<16x32xf32>, vector<2x32xf32> -> vector<18x32xf32>
    %33 = vector.extract_strided_slice %31 {offsets = [1, 0], sizes = [16, 32], strides = [1, 1]} : vector<18x32xf32> to vector<16x32xf32>
    %cst_6 = arith.constant 0.000000e+00 : f32
    %34 = vector.shape_cast %20 : vector<16x1xi1> to vector<16x1xi1>
    %35 = vector.broadcast %34 : vector<16x1xi1> to vector<16x32xi1>
    %36 = vector.broadcast %cst_6 : f32 to vector<16x32xf32>
    %37 = arith.select %35, %33, %36 : vector<16x32xi1>, vector<16x32xf32>
    %38 = vector.extract_strided_slice %31 {offsets = [0, 0], sizes = [16, 32], strides = [1, 1]} : vector<18x32xf32> to vector<16x32xf32>
    %cst_7 = arith.constant 0.000000e+00 : f32
    %39 = vector.shape_cast %22 : vector<16x1xi1> to vector<16x1xi1>
    %40 = vector.broadcast %39 : vector<16x1xi1> to vector<16x32xi1>
    %41 = vector.broadcast %cst_7 : f32 to vector<16x32xf32>
    %42 = arith.select %40, %38, %41 : vector<16x32xi1>, vector<16x32xf32>
    %43 = vector.extract_strided_slice %32 {offsets = [1, 0], sizes = [16, 32], strides = [1, 1]} : vector<18x32xf32> to vector<16x32xf32>
    %cst_8 = arith.constant 0.000000e+00 : f32
    %44 = vector.shape_cast %24 : vector<16x1xi1> to vector<16x1xi1>
    %45 = vector.broadcast %44 : vector<16x1xi1> to vector<16x32xi1>
    %46 = vector.broadcast %cst_8 : f32 to vector<16x32xf32>
    %47 = arith.select %45, %43, %46 : vector<16x32xi1>, vector<16x32xf32>
    %48 = vector.extract_strided_slice %32 {offsets = [2, 0], sizes = [16, 32], strides = [1, 1]} : vector<18x32xf32> to vector<16x32xf32>
    %cst_9 = arith.constant 0.000000e+00 : f32
    %49 = vector.shape_cast %26 : vector<16x1xi1> to vector<16x1xi1>
    %50 = vector.broadcast %49 : vector<16x1xi1> to vector<16x32xi1>
    %51 = vector.broadcast %cst_9 : f32 to vector<16x32xf32>
    %52 = arith.select %50, %48, %51 : vector<16x32xi1>, vector<16x32xf32>
    %53 = tpu.concatenate %29, %37, %42, %28, %30, %47, %52, %28 in 1 : vector<16x32xf32>, vector<16x32xf32>, vector<16x32xf32>, vector<16x32xf32>, vector<16x32xf32>, vector<16x32xf32>, vector<16x32xf32>, vector<16x32xf32> -> vector<16x256xf32>
    %c0_10 = arith.constant 0 : index
    %c0_11 = arith.constant 0 : index
    %c0_12 = arith.constant 0 : index
    %54 = vector.load %arg2[%c0_10, %c0_11, %c0_12] : memref<2x256x64xf32, #tpu.memory_space<vmem>>, vector<1x256x64xf32>
    %55 = vector.shape_cast %54 : vector<1x256x64xf32> to vector<256x64xf32>
    %cst_13 = arith.constant dense<0.000000e+00> : vector<16x64xf32>
    %56 = tpu.matmul %53, %55, %cst_13 {dimension_numbers = #tpu.dot_dimension_numbers<[1], [0], [0], [1], [0, 0, 1, 1], [], []>} : vector<16x256xf32>, vector<256x64xf32>, vector<16x64xf32> -> vector<16x64xf32>
    %cst_14 = arith.constant 0.000000e+00 : f32
    %57 = vector.broadcast %cst_14 : f32 to vector<16x64xf32>
    %58 = arith.maximumf %56, %57 : vector<16x64xf32>
    %c0_15 = arith.constant 0 : index
    %c0_16 = arith.constant 0 : index
    %c0_17 = arith.constant 0 : index
    %c0_18 = arith.constant 0 : index
    %59 = vector.load %arg3[%c0_15, %c0_16, %c0_17, %c0_18] : memref<2x2x64x128xf32, #tpu.memory_space<vmem>>, vector<1x1x64x128xf32>
    %60 = vector.shape_cast %59 : vector<1x1x64x128xf32> to vector<64x128xf32>
    %cst_19 = arith.constant dense<0.000000e+00> : vector<16x128xf32>
    %61 = tpu.matmul %58, %60, %cst_19 {dimension_numbers = #tpu.dot_dimension_numbers<[1], [0], [0], [1], [0, 0, 1, 1], [], []>} : vector<16x64xf32>, vector<64x128xf32>, vector<16x128xf32> -> vector<16x128xf32>
    %c0_20 = arith.constant 0 : index
    %c0_21 = arith.constant 0 : index
    %c0_22 = arith.constant 0 : index
    %c0_23 = arith.constant 0 : index
    %62 = vector.load %arg4[%c0_20, %c0_21, %c0_22, %c0_23] : memref<2x2x1x128xf32, #tpu.memory_space<vmem>>, vector<1x1x1x128xf32>
    %63 = vector.shape_cast %62 : vector<1x1x1x128xf32> to vector<1x128xf32>
    %64 = vector.broadcast %63 : vector<1x128xf32> to vector<16x128xf32>
    %65 = arith.addf %61, %64 : vector<16x128xf32>
    %66 = vector.extract_strided_slice %65 {offsets = [0, 0], sizes = [16, 64], strides = [1, 1]} : vector<16x128xf32> to vector<16x64xf32>
    %cst_24 = arith.constant 0.000000e+00 : f32
    %67 = vector.broadcast %cst_24 : f32 to vector<16x64xf32>
    %68 = arith.maximumf %66, %67 : vector<16x64xf32>
    %69 = vector.extract_strided_slice %65 {offsets = [0, 64], sizes = [16, 64], strides = [1, 1]} : vector<16x128xf32> to vector<16x64xf32>
    %70 = arith.negf %69 : vector<16x64xf32>
    %71 = math.exp %70 : vector<16x64xf32>
    %cst_25 = arith.constant 1.000000e+00 : f32
    %72 = vector.broadcast %cst_25 : f32 to vector<16x64xf32>
    %73 = arith.addf %72, %71 : vector<16x64xf32>
    %74 = arith.divf %72, %73 : vector<16x64xf32>
    %75 = arith.subf %58, %68 : vector<16x64xf32>
    %76 = arith.mulf %74, %75 : vector<16x64xf32>
    %77 = arith.addf %68, %76 : vector<16x64xf32>
    %c0_26 = arith.constant 0 : index
    %c1 = arith.constant 1 : index
    %c0_27 = arith.constant 0 : index
    %c0_28 = arith.constant 0 : index
    %78 = vector.load %arg3[%c0_26, %c1, %c0_27, %c0_28] : memref<2x2x64x128xf32, #tpu.memory_space<vmem>>, vector<1x1x64x128xf32>
    %79 = vector.shape_cast %78 : vector<1x1x64x128xf32> to vector<64x128xf32>
    %cst_29 = arith.constant dense<0.000000e+00> : vector<16x128xf32>
    %80 = tpu.matmul %77, %79, %cst_29 {dimension_numbers = #tpu.dot_dimension_numbers<[1], [0], [0], [1], [0, 0, 1, 1], [], []>} : vector<16x64xf32>, vector<64x128xf32>, vector<16x128xf32> -> vector<16x128xf32>
    %c0_30 = arith.constant 0 : index
    %c1_31 = arith.constant 1 : index
    %c0_32 = arith.constant 0 : index
    %c0_33 = arith.constant 0 : index
    %81 = vector.load %arg4[%c0_30, %c1_31, %c0_32, %c0_33] : memref<2x2x1x128xf32, #tpu.memory_space<vmem>>, vector<1x1x1x128xf32>
    %82 = vector.shape_cast %81 : vector<1x1x1x128xf32> to vector<1x128xf32>
    %83 = vector.broadcast %82 : vector<1x128xf32> to vector<16x128xf32>
    %84 = arith.addf %80, %83 : vector<16x128xf32>
    %85 = vector.extract_strided_slice %84 {offsets = [0, 0], sizes = [16, 64], strides = [1, 1]} : vector<16x128xf32> to vector<16x64xf32>
    %cst_34 = arith.constant 0.000000e+00 : f32
    %86 = vector.broadcast %cst_34 : f32 to vector<16x64xf32>
    %87 = arith.maximumf %85, %86 : vector<16x64xf32>
    %88 = vector.extract_strided_slice %84 {offsets = [0, 64], sizes = [16, 64], strides = [1, 1]} : vector<16x128xf32> to vector<16x64xf32>
    %89 = arith.negf %88 : vector<16x64xf32>
    %90 = math.exp %89 : vector<16x64xf32>
    %cst_35 = arith.constant 1.000000e+00 : f32
    %91 = vector.broadcast %cst_35 : f32 to vector<16x64xf32>
    %92 = arith.addf %91, %90 : vector<16x64xf32>
    %93 = arith.divf %91, %92 : vector<16x64xf32>
    %94 = arith.subf %77, %87 : vector<16x64xf32>
    %95 = arith.mulf %93, %94 : vector<16x64xf32>
    %96 = arith.addf %87, %95 : vector<16x64xf32>
    %c0_36 = arith.constant 0 : index
    %c0_37 = arith.constant 0 : index
    %c0_38 = arith.constant 0 : index
    %97 = vector.load %arg5[%c0_36, %c0_37, %c0_38] : memref<2x16x64xf32, #tpu.memory_space<vmem>>, vector<1x16x64xf32>
    %98 = vector.shape_cast %97 : vector<1x16x64xf32> to vector<16x64xf32>
    %99 = vector.shape_cast %96 : vector<16x64xf32> to vector<1x16x64xf32>
    tpu.vector_store %arg5[%c0_36, %c0_37, %c0_38], %99 {strides = array<i32>} : memref<2x16x64xf32, #tpu.memory_space<vmem>>, vector<1x16x64xf32>,
    %100 = vector.extract_strided_slice %96 {offsets = [0, 0], sizes = [16, 32], strides = [1, 1]} : vector<16x64xf32> to vector<16x32xf32>
    %101 = vector.extract_strided_slice %96 {offsets = [0, 32], sizes = [16, 32], strides = [1, 1]} : vector<16x64xf32> to vector<16x32xf32>
    %102 = tpu.concatenate %27, %100 in 0 : vector<2x32xf32>, vector<16x32xf32> -> vector<18x32xf32>
    %103 = tpu.concatenate %101, %27 in 0 : vector<16x32xf32>, vector<2x32xf32> -> vector<18x32xf32>
    %104 = vector.extract_strided_slice %102 {offsets = [1, 0], sizes = [16, 32], strides = [1, 1]} : vector<18x32xf32> to vector<16x32xf32>
    %cst_39 = arith.constant 0.000000e+00 : f32
    %105 = vector.shape_cast %20 : vector<16x1xi1> to vector<16x1xi1>
    %106 = vector.broadcast %105 : vector<16x1xi1> to vector<16x32xi1>
    %107 = vector.broadcast %cst_39 : f32 to vector<16x32xf32>
    %108 = arith.select %106, %104, %107 : vector<16x32xi1>, vector<16x32xf32>
    %109 = vector.extract_strided_slice %102 {offsets = [0, 0], sizes = [16, 32], strides = [1, 1]} : vector<18x32xf32> to vector<16x32xf32>
    %cst_40 = arith.constant 0.000000e+00 : f32
    %110 = vector.shape_cast %22 : vector<16x1xi1> to vector<16x1xi1>
    %111 = vector.broadcast %110 : vector<16x1xi1> to vector<16x32xi1>
    %112 = vector.broadcast %cst_40 : f32 to vector<16x32xf32>
    %113 = arith.select %111, %109, %112 : vector<16x32xi1>, vector<16x32xf32>
    %114 = vector.extract_strided_slice %103 {offsets = [1, 0], sizes = [16, 32], strides = [1, 1]} : vector<18x32xf32> to vector<16x32xf32>
    %cst_41 = arith.constant 0.000000e+00 : f32
    %115 = vector.shape_cast %24 : vector<16x1xi1> to vector<16x1xi1>
    %116 = vector.broadcast %115 : vector<16x1xi1> to vector<16x32xi1>
    %117 = vector.broadcast %cst_41 : f32 to vector<16x32xf32>
    %118 = arith.select %116, %114, %117 : vector<16x32xi1>, vector<16x32xf32>
    %119 = vector.extract_strided_slice %103 {offsets = [2, 0], sizes = [16, 32], strides = [1, 1]} : vector<18x32xf32> to vector<16x32xf32>
    %cst_42 = arith.constant 0.000000e+00 : f32
    %120 = vector.shape_cast %26 : vector<16x1xi1> to vector<16x1xi1>
    %121 = vector.broadcast %120 : vector<16x1xi1> to vector<16x32xi1>
    %122 = vector.broadcast %cst_42 : f32 to vector<16x32xf32>
    %123 = arith.select %121, %119, %122 : vector<16x32xi1>, vector<16x32xf32>
    %124 = tpu.concatenate %100, %108, %113, %28, %101, %118, %123, %28 in 1 : vector<16x32xf32>, vector<16x32xf32>, vector<16x32xf32>, vector<16x32xf32>, vector<16x32xf32>, vector<16x32xf32>, vector<16x32xf32>, vector<16x32xf32> -> vector<16x256xf32>
    %c1_43 = arith.constant 1 : index
    %c0_44 = arith.constant 0 : index
    %c0_45 = arith.constant 0 : index
    %125 = vector.load %arg2[%c1_43, %c0_44, %c0_45] : memref<2x256x64xf32, #tpu.memory_space<vmem>>, vector<1x256x64xf32>
    %126 = vector.shape_cast %125 : vector<1x256x64xf32> to vector<256x64xf32>
    %cst_46 = arith.constant dense<0.000000e+00> : vector<16x64xf32>
    %127 = tpu.matmul %124, %126, %cst_46 {dimension_numbers = #tpu.dot_dimension_numbers<[1], [0], [0], [1], [0, 0, 1, 1], [], []>} : vector<16x256xf32>, vector<256x64xf32>, vector<16x64xf32> -> vector<16x64xf32>
    %cst_47 = arith.constant 0.000000e+00 : f32
    %128 = vector.broadcast %cst_47 : f32 to vector<16x64xf32>
    %129 = arith.maximumf %127, %128 : vector<16x64xf32>
    %c1_48 = arith.constant 1 : index
    %c0_49 = arith.constant 0 : index
    %c0_50 = arith.constant 0 : index
    %c0_51 = arith.constant 0 : index
    %130 = vector.load %arg3[%c1_48, %c0_49, %c0_50, %c0_51] : memref<2x2x64x128xf32, #tpu.memory_space<vmem>>, vector<1x1x64x128xf32>
    %131 = vector.shape_cast %130 : vector<1x1x64x128xf32> to vector<64x128xf32>
    %cst_52 = arith.constant dense<0.000000e+00> : vector<16x128xf32>
    %132 = tpu.matmul %129, %131, %cst_52 {dimension_numbers = #tpu.dot_dimension_numbers<[1], [0], [0], [1], [0, 0, 1, 1], [], []>} : vector<16x64xf32>, vector<64x128xf32>, vector<16x128xf32> -> vector<16x128xf32>
    %c1_53 = arith.constant 1 : index
    %c0_54 = arith.constant 0 : index
    %c0_55 = arith.constant 0 : index
    %c0_56 = arith.constant 0 : index
    %133 = vector.load %arg4[%c1_53, %c0_54, %c0_55, %c0_56] : memref<2x2x1x128xf32, #tpu.memory_space<vmem>>, vector<1x1x1x128xf32>
    %134 = vector.shape_cast %133 : vector<1x1x1x128xf32> to vector<1x128xf32>
    %135 = vector.broadcast %134 : vector<1x128xf32> to vector<16x128xf32>
    %136 = arith.addf %132, %135 : vector<16x128xf32>
    %137 = vector.extract_strided_slice %136 {offsets = [0, 0], sizes = [16, 64], strides = [1, 1]} : vector<16x128xf32> to vector<16x64xf32>
    %cst_57 = arith.constant 0.000000e+00 : f32
    %138 = vector.broadcast %cst_57 : f32 to vector<16x64xf32>
    %139 = arith.maximumf %137, %138 : vector<16x64xf32>
    %140 = vector.extract_strided_slice %136 {offsets = [0, 64], sizes = [16, 64], strides = [1, 1]} : vector<16x128xf32> to vector<16x64xf32>
    %141 = arith.negf %140 : vector<16x64xf32>
    %142 = math.exp %141 : vector<16x64xf32>
    %cst_58 = arith.constant 1.000000e+00 : f32
    %143 = vector.broadcast %cst_58 : f32 to vector<16x64xf32>
    %144 = arith.addf %143, %142 : vector<16x64xf32>
    %145 = arith.divf %143, %144 : vector<16x64xf32>
    %146 = arith.subf %129, %139 : vector<16x64xf32>
    %147 = arith.mulf %145, %146 : vector<16x64xf32>
    %148 = arith.addf %139, %147 : vector<16x64xf32>
    %c1_59 = arith.constant 1 : index
    %c1_60 = arith.constant 1 : index
    %c0_61 = arith.constant 0 : index
    %c0_62 = arith.constant 0 : index
    %149 = vector.load %arg3[%c1_59, %c1_60, %c0_61, %c0_62] : memref<2x2x64x128xf32, #tpu.memory_space<vmem>>, vector<1x1x64x128xf32>
    %150 = vector.shape_cast %149 : vector<1x1x64x128xf32> to vector<64x128xf32>
    %cst_63 = arith.constant dense<0.000000e+00> : vector<16x128xf32>
    %151 = tpu.matmul %148, %150, %cst_63 {dimension_numbers = #tpu.dot_dimension_numbers<[1], [0], [0], [1], [0, 0, 1, 1], [], []>} : vector<16x64xf32>, vector<64x128xf32>, vector<16x128xf32> -> vector<16x128xf32>
    %c1_64 = arith.constant 1 : index
    %c1_65 = arith.constant 1 : index
    %c0_66 = arith.constant 0 : index
    %c0_67 = arith.constant 0 : index
    %152 = vector.load %arg4[%c1_64, %c1_65, %c0_66, %c0_67] : memref<2x2x1x128xf32, #tpu.memory_space<vmem>>, vector<1x1x1x128xf32>
    %153 = vector.shape_cast %152 : vector<1x1x1x128xf32> to vector<1x128xf32>
    %154 = vector.broadcast %153 : vector<1x128xf32> to vector<16x128xf32>
    %155 = arith.addf %151, %154 : vector<16x128xf32>
    %156 = vector.extract_strided_slice %155 {offsets = [0, 0], sizes = [16, 64], strides = [1, 1]} : vector<16x128xf32> to vector<16x64xf32>
    %cst_68 = arith.constant 0.000000e+00 : f32
    %157 = vector.broadcast %cst_68 : f32 to vector<16x64xf32>
    %158 = arith.maximumf %156, %157 : vector<16x64xf32>
    %159 = vector.extract_strided_slice %155 {offsets = [0, 64], sizes = [16, 64], strides = [1, 1]} : vector<16x128xf32> to vector<16x64xf32>
    %160 = arith.negf %159 : vector<16x64xf32>
    %161 = math.exp %160 : vector<16x64xf32>
    %cst_69 = arith.constant 1.000000e+00 : f32
    %162 = vector.broadcast %cst_69 : f32 to vector<16x64xf32>
    %163 = arith.addf %162, %161 : vector<16x64xf32>
    %164 = arith.divf %162, %163 : vector<16x64xf32>
    %165 = arith.subf %148, %158 : vector<16x64xf32>
    %166 = arith.mulf %164, %165 : vector<16x64xf32>
    %167 = arith.addf %158, %166 : vector<16x64xf32>
    %168 = arith.addf %167, %96 : vector<16x64xf32>
    %c1_70 = arith.constant 1 : index
    %c0_71 = arith.constant 0 : index
    %c0_72 = arith.constant 0 : index
    %169 = vector.load %arg5[%c1_70, %c0_71, %c0_72] : memref<2x16x64xf32, #tpu.memory_space<vmem>>, vector<1x16x64xf32>
    %170 = vector.shape_cast %169 : vector<1x16x64xf32> to vector<16x64xf32>
    %171 = vector.shape_cast %168 : vector<16x64xf32> to vector<1x16x64xf32>
    tpu.vector_store %arg5[%c1_70, %c0_71, %c0_72], %171 {strides = array<i32>} : memref<2x16x64xf32, #tpu.memory_space<vmem>>, vector<1x16x64xf32>,
    return
  }
  func.func @transform_0(%arg0: i32) -> (i32, i32) {
    %c0_i32 = arith.constant 0 : i32
    %c0_i32_0 = arith.constant 0 : i32
    return %arg0, %c0_i32 : i32, i32
  }
  func.func @transform_1(%arg0: i32) -> (i32, i32, i32) {
    %c0_i32 = arith.constant 0 : i32
    %c0_i32_0 = arith.constant 0 : i32
    %c0_i32_1 = arith.constant 0 : i32
    %c0_i32_2 = arith.constant 0 : i32
    return %c0_i32, %c0_i32_0, %c0_i32_1 : i32, i32, i32
  }
  func.func @transform_2(%arg0: i32) -> (i32, i32, i32, i32) {
    %c0_i32 = arith.constant 0 : i32
    %c0_i32_0 = arith.constant 0 : i32
    %c0_i32_1 = arith.constant 0 : i32
    %c0_i32_2 = arith.constant 0 : i32
    %c0_i32_3 = arith.constant 0 : i32
    return %c0_i32, %c0_i32_0, %c0_i32_1, %c0_i32_2 : i32, i32, i32, i32
  }
  func.func @transform_3(%arg0: i32) -> (i32, i32, i32, i32) {
    %c0_i32 = arith.constant 0 : i32
    %c0_i32_0 = arith.constant 0 : i32
    %c0_i32_1 = arith.constant 0 : i32
    %c0_i32_2 = arith.constant 0 : i32
    %c0_i32_3 = arith.constant 0 : i32
    return %c0_i32, %c0_i32_0, %c0_i32_1, %c0_i32_2 : i32, i32, i32, i32
  }
  func.func @transform_4(%arg0: i32) -> (i32, i32, i32) {
    %c0_i32 = arith.constant 0 : i32
    %c0_i32_0 = arith.constant 0 : i32
    %c0_i32_1 = arith.constant 0 : i32
    return %c0_i32, %arg0, %c0_i32_0 : i32, i32, i32
  }
}

</mosaic_0001>

<bundles_post_ra>
// kernel: bengio03_highway_bilm_v2.1
= control target key start
LH: loop header
LB: loop body
LE: loop exit
PB: predicated region body
PF: predicated region fallthrough
CT: control target
= control target key end

     0   :  { %s1524_s17 = smov 32   ;;  %s2076_s0 = inlined_call_operand.vmem [shape: f32[16,32], index: 0, kind: input, shape index: {}]   ;;  %s2077_s1 = inlined_call_operand.vmem [shape: f32[2,256,64], index: 1, kind: input, shape index: {}]   ;;  %s2078_s2 = inlined_call_operand.vmem [shape: f32[2,2,64,128], index: 2, kind: input, shape index: {}]   ;;  %s2079_s3 = inlined_call_operand.vmem [shape: f32[2,2,1,128], index: 3, kind: input, shape index: {}]   ;;  %s2080_s4 = inlined_call_operand.hbm [shape: f32[2,16,64], index: 4, kind: output, shape index: {}]  }
   0x1   :  { %v18_v0 = vld [vmem:[%s2076_s0] sm:$0xff]  ;;  %v19_v1 = vld [vmem:[%s2076_s0 + $0x8] sm:$0xff] }
   0x2   :  { %22 = vrot.lane.b32.xlu0 %v18_v0, %s1524_s17 }
   0x3   :  { %9 = vsyncpa [#allocation3], 0  ;;  %vm28_vm0 = vcmask 261120   ;;  %v31_v3 = vlaneseq  ;;  %v1525_v6 = vmov 0.0   ;;  %vm80_vm1 = vcmask 1046528   ;;  %s1526_s0 = smov 96  }
   0x4   :  { %v1567_v7 = vrot.slane %v1525_v6, 1  ;;  %vm68_vm2 = vcmask 1041408   ;;  %vm118_vm3 = vcmask 1045504   ;;  %v200_v20 = vld [vmem:[%s2077_s1 + $0x80] sm:$0xff]  ;;  %v201_v21 = vld [vmem:[%s2077_s1 + $0x88] sm:$0xff]  ;;  %v202_v27 = vld [vmem:[%s2077_s1 + $0x90] sm:$0xff] }
   0x5   :  { %v1572_v9 = vshrl.u32 %v31_v3, 7  ;;  %v1333_v24 = vpack.c.bf16 %v201_v21, %v200_v20  ;;  %v184_v25 = vld [vmem:[%s2077_s1] sm:$0xff]  ;;  %v185_v26 = vld [vmem:[%s2077_s1 + $0x8] sm:$0xff]  ;;  %v1607_v28 = vrot.slane %v1525_v6, 2  ;;  %v203_v30 = vld [vmem:[%s2077_s1 + $0x98] sm:$0xff]  ;;  %s1527_s23 = smov 64  }
   0x6   :  { %24 = vrot.lane.b32.xlu0 %v19_v1, %s1524_s17  ;;  %v1335_v29 = vpack.c.bf16 %v185_v26, %v184_v25  ;;  %v186_v31 = vld [vmem:[%s2077_s1 + $0x10] sm:$0xff]  ;;  %v187_v32 = vld [vmem:[%s2077_s1 + $0x18] sm:$0xff]  ;;  %v1337_v36 = vpack.c.bf16 %v203_v30, %v202_v27  ;;  %v204_v37 = vld [vmem:[%s2077_s1 + $0xa0] sm:$0xff]  ;;  %vm172_vm12 = vcmask 523264   ;;  %vm175_vm13 = vcmask 785408  }
   0x7   :  { %v1585_v17 = vand.u32 7, %v1572_v9  ;;  %1334 = vmatprep.subr.bf16.mxu0 %v1333_v24  ;;  %v205_v38 = vld [vmem:[%s2077_s1 + $0xa8] sm:$0xff]  ;;  %v1339_v39 = vpack.c.bf16 %v187_v32, %v186_v31  ;;  %v188_v42 = vld [vmem:[%s2077_s1 + $0x20] sm:$0xff]  ;;  %v206_v46 = vld [vmem:[%s2077_s1 + $0xb0] sm:$0xff]  ;;  %v33_v21 = vadd.s32 8, %v1572_v9 }
   0x8   :  { %1336 = vmatpush3.bf16.msra.mxu0 %v1335_v29  ;;  %v1341_v41 = vpack.c.bf16 %v205_v38, %v204_v37  ;;  %v189_v43 = vld [vmem:[%s2077_s1 + $0x28] sm:$0xff]  ;;  %v207_v47 = vld [vmem:[%s2077_s1 + $0xb8] sm:$0xff]  ;;  %v190_v51 = vld [vmem:[%s2077_s1 + $0x30] sm:$0xff] }
   0x9   :  { %vm60_vm4 = vcmp.ge.s32.totalorder %v1585_v17, 2  ;;  %1338 = vmatprep.subr.bf16.mxu0 %v1337_v36  ;;  %vm58_vm5 = vcmp.ge.s32.totalorder %v1585_v17, 1  ;;  %v1343_v49 = vpack.c.bf16 %v189_v43, %v188_v42  ;;  %v1345_v50 = vpack.c.bf16 %v207_v47, %v206_v46  ;;  %v191_v52 = vld [vmem:[%s2077_s1 + $0x38] sm:$0xff]  ;;  %v208_v54 = vld [vmem:[%s2077_s1 + $0xc0] sm:$0xff]  ;;  %v209_v55 = vld [vmem:[%s2077_s1 + $0xc8] sm:$0xff] }
   0xa   :  { %v1347_v56 = vpack.c.bf16 %v191_v52, %v190_v51  ;;  %v1349_v57 = vpack.c.bf16 %v209_v55, %v208_v54  ;;  %v192_v58 = vld [vmem:[%s2077_s1 + $0x40] sm:$0xff]  ;;  %v193_v59 = vld [vmem:[%s2077_s1 + $0x48] sm:$0xff]  ;;  %v210_v60 = vld [vmem:[%s2077_s1 + $0xd0] sm:$0xff]  ;;  %vm62_vm7 = vcmp.lt.s32.totalorder %v1585_v17, 7  ;;  %vm64_vm8 = vcmp.lt.s32.totalorder %v1585_v17, 6 }
   0xb   :  { %v211_v61 = vld [vmem:[%s2077_s1 + $0xd8] sm:$0xff]  ;;  %v1351_v62 = vpack.c.bf16 %v193_v59, %v192_v58  ;;  %v213_v3 = vld [vmem:[%s2077_s1 + $0xe8] sm:$0xff]  ;;  %v293_v9 = vld [vmem:[%s2078_s2] sm:$0xff] }
   0xc   :  { %1340 = vmatpush3.bf16.msra.mxu0 %v1339_v39  ;;  %v1353_v63 = vpack.c.bf16 %v211_v61, %v210_v60  ;;  %v294_v27 = vld [vmem:[%s2078_s2 + $0x8] sm:$0xff]  ;;  %v295_v52 = vld [vmem:[%s2078_s2 + $0x10] sm:$0xff]  ;;  %v300_v58 = vld [vmem:[%s2078_s2 + $0x38] sm:$0xff] }
   0xd   :  { %1342 = vmatprep.subr.bf16.mxu0 %v1341_v41  ;;  %v1365_v29 = vpack.c.bf16 %v294_v27, %v293_v9  ;;  %v298_v55 = vld [vmem:[%s2078_s2 + $0x28] sm:$0xff] }
   0xf   :  { %1366 = vmatprep.subr.bf16.mxu1 %v1365_v29 }
  0x10   :  { %1344 = vmatpush3.bf16.msra.mxu0 %v1343_v49  ;;  %1368 = vmatpush3.bf16.msra.mxu1 %v1365_v29 }
  0x11   :  { %1346 = vmatprep.subr.bf16.mxu0 %v1345_v50 }
  0x14   :  { %1348 = vmatpush3.bf16.msra.mxu0 %v1347_v56 }
  0x15   :  { %1350 = vmatprep.subr.bf16.mxu0 %v1349_v57  ;;  %v299_v57 = vld [vmem:[%s2078_s2 + $0x30] sm:$0xff] }
  0x16   :  { %v1377_v59 = vpack.c.bf16 %v300_v58, %v299_v57 }
  0x18   :  { %1352 = vmatpush3.bf16.msra.mxu0 %v1351_v62 }
  0x19   :  { %1354 = vmatprep.subr.bf16.mxu0 %v1353_v63 }
  0x74   :  { %v23_v2 = vpop.permute.xlu0 %22 }
  0x75   :  { %v1565_v4 = vsel %vm28_vm0, %v18_v0, %v23_v2  ;;  %v194_v0 = vld [vmem:[%s2077_s1 + $0x50] sm:$0xff]  ;;  %v212_v2 = vld [vmem:[%s2077_s1 + $0xe0] sm:$0xff] }
  0x76   :  { %v101_v12 = vrot.slane %v1565_v4, 1  ;;  %v69_v13 = vrot.slane %v1565_v4, 6  ;;  %v119_v22 = vrot.slane %v1565_v4, 2  ;;  %v1357_v6 = vpack.c.bf16 %v213_v3, %v212_v2 }
  0x78   :  { %v25_v5 = vpop.permute.xlu0 %24  ;;  %v74_v34 = vsel %vm68_vm2, 0.0, %v69_v13 }
  0x79   :  { %v1570_v8 = vsel %vm28_vm0, %v19_v1, %v25_v5  ;;  %v81_v40 = vrot.slane %v74_v34, 1  ;;  %v94_v44 = vsel %vm60_vm4, %v74_v34, 0.0  ;;  %v195_v1 = vld [vmem:[%s2077_s1 + $0x58] sm:$0xff] }
  0x7a   :  { %v70_v10 = vrot.slane %v1570_v8, 6  ;;  %v102_v11 = vrot.slane %v1570_v8, 1  ;;  %v120_v16 = vrot.slane %v1570_v8, 2  ;;  %v1355_v5 = vpack.c.bf16 %v195_v1, %v194_v0 }
  0x7c   :  { %v105_v14 = vsel %vm80_vm1, %v102_v11, %v1567_v7  ;;  %v103_v15 = vsel %vm80_vm1, %v101_v12, %v102_v11  ;;  %v1588_v18 = vsel %vm68_vm2, %v69_v13, %v70_v10  ;;  %v84_v19 = vrot.slane %v70_v10, 1  ;;  %v196_v10 = vld [vmem:[%s2077_s1 + $0x60] sm:$0xff]  ;;  %v197_v11 = vld [vmem:[%s2077_s1 + $0x68] sm:$0xff]  ;;  %1356 = vmatpush3.bf16.msra.mxu0 %v1355_v5  ;;  %v214_v13 = vld [vmem:[%s2077_s1 + $0xf0] sm:$0xff] }
  0x7d   :  { %108 = vrot.lane.b32.xlu0 %v105_v14, %s1526_s0  ;;  %106 = vrot.lane.b32.xlu1 %v103_v15, %s1526_s0  ;;  %v82_v23 = vrot.slane %v1588_v18, 1  ;;  %v121_v33 = vsel %vm118_vm3, %v119_v22, %v120_v16  ;;  %v123_v45 = vsel %vm118_vm3, %v120_v16, %v1607_v28  ;;  %v1359_v12 = vpack.c.bf16 %v197_v11, %v196_v10  ;;  %v215_v14 = vld [vmem:[%s2077_s1 + $0xf8] sm:$0xff]  ;;  %v198_v15 = vld [vmem:[%s2077_s1 + $0x70] sm:$0xff] }
  0x7e   :  { %1358 = vmatprep.subr.bf16.mxu0 %v1357_v6  ;;  %v1361_v16 = vpack.c.bf16 %v215_v14, %v214_v13  ;;  %v1713_v22 = vand.u32 7, %v33_v21  ;;  %v1063_v5 = vld [vmem:[%s2078_s2 + $0x40] sm:$0xff]  ;;  %v1064_v6 = vld [vmem:[%s2078_s2 + $0x48] sm:$0xff]  ;;  %v1065_v10 = vld [vmem:[%s2078_s2 + $0x50] sm:$0xff] }
  0x7f   :  { %v1621_v35 = vsel %vm80_vm1, %v82_v23, %v84_v19  ;;  %v83_v48 = vsel %vm80_vm1, %v81_v40, %v82_v23  ;;  %v199_v19 = vld [vmem:[%s2077_s1 + $0x78] sm:$0xff]  ;;  %v1058_v11 = vld [vmem:[%s2079_s3] ss:$0 sm:$0xff] }
  0x80   :  { %v88_v53 = vsel %vm58_vm5, %v83_v48, 0.0  ;;  %1360 = vmatpush3.bf16.msra.mxu0 %v1359_v12  ;;  %v1363_v20 = vpack.c.bf16 %v199_v19, %v198_v15  ;;  %vm63_vm6 = vcmp.lt.s32.totalorder %v1713_v22, 7  ;;  %vm65_vm9 = vcmp.lt.s32.totalorder %v1713_v22, 6  ;;  %v1066_v13 = vld [vmem:[%s2078_s2 + $0x58] sm:$0xff]  ;;  %v1067_v15 = vld [vmem:[%s2078_s2 + $0x60] sm:$0xff] }
  0x81   :  { %148 = vrot.lane.b32.xlu0 %v1565_v4, %s1526_s0  ;;  %124 = vrot.lane.b32.xlu1 %v121_v33, %s1526_s0  ;;  %vm59_vm10 = vcmp.ge.s32.totalorder %v1713_v22, 1  ;;  %vm61_vm11 = vcmp.ge.s32.totalorder %v1713_v22, 2  ;;  %v1381_v12 = vpack.c.bf16 %v1064_v6, %v1063_v5  ;;  %v1385_v14 = vpack.c.bf16 %v1066_v13, %v1065_v10 }
  0x82   :  { %1362 = vmatprep.subr.bf16.mxu0 %v1361_v16  ;;  %v89_v34 = vsel %vm59_vm10, %v1621_v35, 0.0  ;;  %v95_v36 = vsel %vm61_vm11, %v1588_v18, 0.0  ;;  %v1068_v16 = vld [vmem:[%s2078_s2 + $0x68] sm:$0xff] }
  0x84   :  { %1364 = vmatpush3.bf16.msra.mxu0 %v1363_v20 }
  0x85   :  { %142 = vrot.lane.b32.xlu0 %v94_v44, %s1527_s23  ;;  %126 = vrot.lane.b32.xlu1 %v123_v45, %s1526_s0 }
  0x89   :  { %150 = vrot.lane.b32.xlu1 %v1570_v8, %s1526_s0  ;;  %134 = vrot.lane.b32.xlu0 %v88_v53, %s1524_s17  ;;  %v296_v53 = vld [vmem:[%s2078_s2 + $0x18] sm:$0xff] }
  0x8a   :  { %v1369_v54 = vpack.c.bf16 %v296_v53, %v295_v52 }
  0x8c   :  { %1370 = vmatprep.subr.bf16.mxu1 %v1369_v54 }
  0x8d   :  { %1372 = vmatpush3.bf16.msra.mxu1 %v1369_v54 }
  0xef   :  { %v109_v23 = vpop.permute.xlu0 %108  ;;  %v107_v24 = vpop.permute.xlu1 %106 }
  0xf0   :  { %v113_v25 = vsel %vm63_vm6, %v109_v23, 0.0  ;;  %v112_v26 = vsel %vm62_vm7, %v107_v24, 0.0  ;;  %v1389_v24 = vpack.c.bf16 %v1068_v16, %v1067_v15 }
  0xf1   :  { %156 = vrot.lane.b32.xlu1 %v112_v26, %s1524_s17  ;;  %158 = vrot.lane.b32.xlu0 %v113_v25, %s1524_s17 }
  0xf3   :  { %v125_v30 = vpop.permute.xlu1 %124  ;;  %v149_v37 = vpop.permute.xlu0 %148 }
  0xf4   :  { %v130_v31 = vsel %vm64_vm8, %v125_v30, 0.0 }
  0xf5   :  { %164 = vrot.lane.b32.xlu1 %v130_v31, %s1527_s23 }
  0xf7   :  { %v127_v32 = vpop.permute.xlu1 %126  ;;  %v143_v38 = vpop.permute.xlu0 %142 }
  0xf8   :  { %v131_v33 = vsel %vm65_vm9, %v127_v32, 0.0 }
  0xf9   :  { %136 = vrot.lane.b32.xlu1 %v89_v34, %s1524_s17  ;;  %166 = vrot.lane.b32.xlu0 %v131_v33, %s1527_s23 }
  0xfb   :  { %v151_v39 = vpop.permute.xlu1 %150  ;;  %v135_v40 = vpop.permute.xlu0 %134 }
  0xfc   :  { %v170_v35 = vsel %vm28_vm0, %v1565_v4, %v135_v40 }
  0xfd   :  { %144 = vrot.lane.b32.xlu1 %v95_v36, %s1527_s23  ;;  %v173_v18 = vsel %vm172_vm12, %v170_v35, %v143_v38  ;;  %v1069_v36 = vld [vmem:[%s2078_s2 + $0x70] sm:$0xff] }
 0x163   :  { %v157_v41 = vpop.permute.xlu1 %156  ;;  %v159_v43 = vpop.permute.xlu0 %158 }
 0x164   :  { %v178_v42 = vsel %vm28_vm0, %v149_v37, %v157_v41  ;;  %v179_v46 = vsel %vm28_vm0, %v151_v39, %v159_v43  ;;  %v1070_v37 = vld [vmem:[%s2078_s2 + $0x78] sm:$0xff] }
 0x165   :  { %v1393_v38 = vpack.c.bf16 %v1070_v37, %v1069_v36  ;;  %v1080_v36 = vld [vmem:[%s2077_s1 + $0x118] sm:$0xff] }
 0x167   :  { %v165_v44 = vpop.permute.xlu1 %164 }
 0x168   :  { %v180_v45 = vsel %vm172_vm12, %v178_v42, %v165_v44 }
 0x169   :  { %1054 = vmatprep.mubr.msk.f32.mxu0 %vm175_vm13, %v180_v45 }
 0x16a   :  { %1055 = vmatmul.mubr.msk.f32.vlgmr.msra.gmra.mrb[0].mxu0 %vm175_vm13, %v173_v18 }
 0x16b   :  { %v137_v47 = vpop.permute.xlu1 %136  ;;  %v167_v48 = vpop.permute.xlu0 %166 }
 0x16c   :  { %v181_v4 = vsel %vm172_vm12, %v179_v46, %v167_v48  ;;  %v171_v49 = vsel %vm28_vm0, %v1570_v8, %v137_v47  ;;  %v297_v8 = vld [vmem:[%s2078_s2 + $0x20] sm:$0xff] }
 0x16d   :  { %1056 = vmatprep.mubr.msk.f32.mxu0 %vm175_vm13, %v181_v4  ;;  %v1373_v56 = vpack.c.bf16 %v298_v55, %v297_v8  ;;  %v1072_v47 = vld [vmem:[%s2079_s3 + $0x1] ss:$0 sm:$0xff] }
 0x16f   :  { %v145_v50 = vpop.permute.xlu1 %144  ;;  %1374 = vmatprep.subr.bf16.mxu1 %v1373_v56 }
 0x170   :  { %v174_v51 = vsel %vm172_vm12, %v171_v49, %v145_v50  ;;  %1376 = vmatpush3.bf16.msra.mxu1 %v1373_v56 }
 0x171   :  { %1057 = vmatmul.mubr.msk.f32.gmra.mrb[2].mxu0 %vm175_vm13, %v174_v51  ;;  %1378 = vmatprep.subr.bf16.mxu1 %v1377_v59 }
 0x174   :  { %1380 = vmatpush3.bf16.msra.mxu1 %v1377_v59 }
 0x175   :  { %1382 = vmatprep.subr.bf16.mxu1 %v1381_v12 }
 0x23d   :  { %v1173_v60 = vpop.f32.mrb[0].mxu0 }
 0x23e   :  { %v1174_v61 = vpop.f32.mrb[1].mxu0 }
 0x23f   :  { %v1175_v62 = vadd.f32 %v1174_v61, %v1173_v60 }
 0x241   :  { %v291_v63 = vmax.f32 %v1175_v62, 0.0 }
 0x243   :  { %1273 = vmatprep.mubr.msk.f32.mxu1 %vm172_vm12, %v291_v63 }
 0x244   :  { %v1176_v0 = vpop.f32.mrb[2].mxu0 }
 0x245   :  { %v1177_v1 = vpop.f32.mrb[3].mxu0 }
 0x246   :  { %v1178_v2 = vadd.f32 %v1177_v1, %v1176_v0 }
 0x248   :  { %v292_v3 = vmax.f32 %v1178_v2, 0.0 }
 0x24a   :  { %1274 = vmatmul.mubr.msk.f32.vlgmr.msra.gmra.mrb[0].mxu1 %vm172_vm12, %v292_v3 }
 0x24b   :  { %1384 = vmatpush3.bf16.msra.mxu1 %v1381_v12 }
 0x24c   :  { %1386 = vmatprep.subr.bf16.mxu1 %v1385_v14 }
 0x24f   :  { %1388 = vmatpush3.bf16.msra.mxu1 %v1385_v14 }
 0x250   :  { %1390 = vmatprep.subr.bf16.mxu1 %v1389_v24 }
 0x253   :  { %1392 = vmatpush3.bf16.msra.mxu1 %v1389_v24 }
 0x254   :  { %1394 = vmatprep.subr.bf16.mxu1 %v1393_v38 }
 0x257   :  { %1396 = vmatpush3.bf16.msra.mxu1 %v1393_v38  ;;  %v1097_v38 = vld [vmem:[%s2077_s1 + $0x1a0] sm:$0xff] }
 0x31d   :  { %v1275_v19 = vpop.f32.mrb[0].mxu1 }
 0x31e   :  { %v386_v20 = vadd.f32 %v1275_v19, %v1058_v11  ;;  %v380_v21 = vpop.f32.mrb[1].mxu1 }
 0x31f   :  { %v381_v23 = vadd.f32 %v1058_v11, %v380_v21 }
 0x320   :  { %v390_v25 = vmax.f32 %v386_v20, 0.0  ;;  %v1062_v29 = vmul.f32 -1.442695, %v386_v20 }
 0x321   :  { %v389_v26 = vmax.f32 %v381_v23, 0.0  ;;  %v1061_v30 = vmul.f32 -1.442695, %v381_v23 }
 0x322   :  { %v404_v9 = vsub.f32 %v292_v3, %v390_v25  ;;  %1468 = vpow2.f32 %v1062_v29 }
 0x323   :  { %v403_v27 = vsub.f32 %v291_v63, %v389_v26  ;;  %1470 = vpow2.f32 %v1061_v30 }
 0x324   :  { %409 = vrot.lane.b32.xlu1 %v404_v9, %s1527_s23  ;;  %v1093_v9 = vld [vmem:[%s2077_s1 + $0x180] sm:$0xff] }
 0x325   :  { %407 = vrot.lane.b32.xlu0 %v403_v27, %s1527_s23  ;;  %v1094_v27 = vld [vmem:[%s2077_s1 + $0x188] sm:$0xff] }
 0x326   :  { %v1397_v30 = vpack.c.bf16 %v1094_v27, %v1093_v9 }
 0x328   :  { %1398 = vmatprep.subr.bf16.mxu0 %v1397_v30 }
 0x32c   :  { %v1469_v31 = vpop.eup %1468 }
 0x32d   :  { %v1471_v32 = vpop.eup %1470  ;;  %v398_v33 = vadd.f32 1.0, %v1469_v31  ;;  %v1095_v31 = vld [vmem:[%s2077_s1 + $0x190] sm:$0xff] }
 0x32e   :  { %v397_v34 = vadd.f32 1.0, %v1471_v32 }
 0x32f   :  { %1472 = vrcp.f32 %v398_v33  ;;  %v1096_v33 = vld [vmem:[%s2077_s1 + $0x198] sm:$0xff] }
 0x330   :  { %1474 = vrcp.f32 %v397_v34  ;;  %v1079_v34 = vld [vmem:[%s2077_s1 + $0x110] sm:$0xff]  ;;  %v1401_v37 = vpack.c.bf16 %v1096_v33, %v1095_v31 }
 0x339   :  { %v1473_v39 = vpop.eup %1472 }
 0x33a   :  { %v1475_v41 = vpop.eup %1474 }
 0x396   :  { %v410_v40 = vpop.permute.xlu1 %409 }
 0x397   :  { %v414_v35 = vmul.f32 %v1473_v39, %v410_v40  ;;  %v408_v42 = vpop.permute.xlu0 %407  ;;  %v1098_v39 = vld [vmem:[%s2077_s1 + $0x1a8] sm:$0xff] }
 0x398   :  { %v413_v43 = vmul.f32 %v1475_v41, %v408_v42  ;;  %v1403_v41 = vpack.c.bf16 %v1080_v36, %v1079_v34  ;;  %v1081_v42 = vld [vmem:[%s2077_s1 + $0x120] sm:$0xff] }
 0x399   :  { %419 = vrot.lane.b32.xlu1 %v414_v35, %s1527_s23  ;;  %v1405_v35 = vpack.c.bf16 %v1098_v39, %v1097_v38 }
 0x39a   :  { %417 = vrot.lane.b32.xlu0 %v413_v43, %s1527_s23  ;;  %v1082_v43 = vld [vmem:[%s2077_s1 + $0x128] sm:$0xff] }
 0x40b   :  { %v420_v44 = vpop.permute.xlu1 %419 }
 0x40c   :  { %v418_v45 = vpop.permute.xlu0 %417  ;;  %v424_v46 = vadd.f32 %v420_v44, %v390_v25 }
 0x40d   :  { %v423_v18 = vadd.f32 %v418_v45, %v389_v26  ;;  %v1099_v45 = vld [vmem:[%s2077_s1 + $0x1b0] sm:$0xff] }
 0x40f   :  { %1292 = vmatprep.mubr.msk.f32.mxu1 %vm172_vm12, %v423_v18 }
 0x410   :  { %1293 = vmatmul.mubr.msk.f32.vlgmr.msra.gmra.mrb[2].mxu1 %vm172_vm12, %v424_v46 }
 0x4e3   :  { %v1294_v48 = vpop.f32.mrb[2].mxu1 }
 0x4e4   :  { %v520_v4 = vadd.f32 %v1294_v48, %v1072_v47  ;;  %v514_v49 = vpop.f32.mrb[3].mxu1 }
 0x4e5   :  { %v515_v50 = vadd.f32 %v1072_v47, %v514_v49  ;;  %v1407_v47 = vpack.c.bf16 %v1082_v43, %v1081_v42  ;;  %v1084_v49 = vld [vmem:[%s2077_s1 + $0x138] sm:$0xff] }
 0x4e6   :  { %v524_v51 = vmax.f32 %v520_v4, 0.0  ;;  %v1076_v8 = vmul.f32 -1.442695, %v520_v4  ;;  %v1083_v4 = vld [vmem:[%s2077_s1 + $0x130] sm:$0xff] }
 0x4e7   :  { %v523_v52 = vmax.f32 %v515_v50, 0.0  ;;  %v1075_v55 = vmul.f32 -1.442695, %v515_v50 }
 0x4e8   :  { %v538_v53 = vsub.f32 %v424_v46, %v524_v51  ;;  %1476 = vpow2.f32 %v1076_v8  ;;  %v1085_v8 = vld [vmem:[%s2077_s1 + $0x140] sm:$0xff] }
 0x4e9   :  { %v537_v54 = vsub.f32 %v423_v18, %v523_v52  ;;  %1478 = vpow2.f32 %v1075_v55  ;;  %v1100_v18 = vld [vmem:[%s2077_s1 + $0x1b8] sm:$0xff]  ;;  %v1086_v55 = vld [vmem:[%s2077_s1 + $0x148] sm:$0xff] }
 0x4ea   :  { %543 = vrot.lane.b32.xlu1 %v538_v53, %s1527_s23  ;;  %v1409_v48 = vpack.c.bf16 %v1100_v18, %v1099_v45  ;;  %v1411_v53 = vpack.c.bf16 %v1084_v49, %v1083_v4  ;;  %v1117_v4 = vld [vmem:[%s2078_s2 + $0xa0] sm:$0xff]  ;;  %v1118_v49 = vld [vmem:[%s2078_s2 + $0xa8] sm:$0xff] }
 0x4eb   :  { %541 = vrot.lane.b32.xlu0 %v537_v54, %s1527_s23 }
 0x4f2   :  { %v1477_v56 = vpop.eup %1476 }
 0x4f3   :  { %v1479_v57 = vpop.eup %1478  ;;  %v532_v58 = vadd.f32 1.0, %v1477_v56  ;;  %v1103_v56 = vld [vmem:[%s2077_s1 + $0x1d0] sm:$0xff] }
 0x4f4   :  { %v531_v59 = vadd.f32 1.0, %v1479_v57  ;;  %v1104_v57 = vld [vmem:[%s2077_s1 + $0x1d8] sm:$0xff] }
 0x4f5   :  { %1480 = vrcp.f32 %v532_v58  ;;  %v1415_v58 = vpack.c.bf16 %v1086_v55, %v1085_v8 }
 0x4f6   :  { %1482 = vrcp.f32 %v531_v59  ;;  %v1417_v59 = vpack.c.bf16 %v1104_v57, %v1103_v56 }
 0x4ff   :  { %v1481_v60 = vpop.eup %1480 }
 0x500   :  { %v1483_v62 = vpop.eup %1482 }
 0x55c   :  { %v544_v61 = vpop.permute.xlu1 %543 }
 0x55d   :  { %v548_v63 = vmul.f32 %v1481_v60, %v544_v61  ;;  %v542_v0 = vpop.permute.xlu0 %541  ;;  %v1087_v60 = vld [vmem:[%s2077_s1 + $0x150] sm:$0xff]  ;;  %v1088_v61 = vld [vmem:[%s2077_s1 + $0x158] sm:$0xff] }
 0x55e   :  { %v547_v1 = vmul.f32 %v1483_v62, %v542_v0  ;;  %v1105_v62 = vld [vmem:[%s2077_s1 + $0x1e0] sm:$0xff]  ;;  %v1419_v0 = vpack.c.bf16 %v1088_v61, %v1087_v60 }
 0x55f   :  { %553 = vrot.lane.b32.xlu1 %v548_v63, %s1527_s23  ;;  %v1106_v63 = vld [vmem:[%s2077_s1 + $0x1e8] sm:$0xff]  ;;  %v1127_v61 = vld [vmem:[%s2078_s2 + $0xc0] sm:$0xff] }
 0x560   :  { %551 = vrot.lane.b32.xlu0 %v547_v1, %s1527_s23  ;;  %v1421_v1 = vpack.c.bf16 %v1106_v63, %v1105_v62  ;;  %v1128_v62 = vld [vmem:[%s2078_s2 + $0xc8] sm:$0xff]  ;;  %v1129_v63 = vld [vmem:[%s2078_s2 + $0xd0] sm:$0xff] }
 0x5d1   :  { %v554_v2 = vpop.permute.xlu1 %553 }
 0x5d2   :  { %v1821_v3 = vadd.f32 %v554_v2, %v524_v51  ;;  %v552_v5 = vpop.permute.xlu0 %551  ;;  %v1101_v51 = vld [vmem:[%s2077_s1 + $0x1c0] sm:$0xff] }
 0x5d3   :  { %v1823_v6 = vadd.f32 %v552_v5, %v523_v52  ;;  %v1102_v52 = vld [vmem:[%s2077_s1 + $0x1c8] sm:$0xff]  ;;  %v1089_v2 = vld [vmem:[%s2077_s1 + $0x160] sm:$0xff] }
 0x5d4   :  { %560 = vst.msk [vmem:[#allocation2 + $0x8] sm:$0xff] %vm172_vm12, %v1821_v3  ;;  %v594_v10 = vrot.slane %v1821_v3, 2  ;;  %v582_v11 = vrot.slane %v1821_v3, 1  ;;  %v564_v12 = vrot.slane %v1821_v3, 6  ;;  %v1413_v54 = vpack.c.bf16 %v1102_v52, %v1101_v51  ;;  %v1090_v5 = vld [vmem:[%s2077_s1 + $0x168] sm:$0xff]  ;;  %v1119_v51 = vld [vmem:[%s2078_s2 + $0xb0] sm:$0xff] }
 0x5d5   :  { %559 = vst.msk [vmem:[#allocation2] sm:$0xff] %vm172_vm12, %v1823_v6  ;;  %v593_v13 = vrot.slane %v1823_v6, 2  ;;  %v581_v14 = vrot.slane %v1823_v6, 1  ;;  %v563_v15 = vrot.slane %v1823_v6, 6  ;;  %v1120_v52 = vld [vmem:[%s2078_s2 + $0xb8] sm:$0xff] }
 0x5d6   :  { %v573_v23 = vrot.slane %v564_v12, 1  ;;  %v596_v25 = vsel %vm118_vm3, %v594_v10, %v1607_v28  ;;  %v584_v26 = vsel %vm80_vm1, %v582_v11, %v1567_v7  ;;  %v1077_v28 = vld [vmem:[%s2077_s1 + $0x100] sm:$0xff]  ;;  %v1078_v7 = vld [vmem:[%s2077_s1 + $0x108] sm:$0xff] }
 0x5d7   :  { %v595_v16 = vsel %vm118_vm3, %v593_v13, %v594_v10  ;;  %v583_v19 = vsel %vm80_vm1, %v581_v14, %v582_v11  ;;  %v1838_v20 = vsel %vm68_vm2, %v563_v15, %v564_v12  ;;  %v568_v29 = vsel %vm68_vm2, 0.0, %v563_v15  ;;  %v1107_v11 = vld [vmem:[%s2077_s1 + $0x1f0] sm:$0xff]  ;;  %v1108_v12 = vld [vmem:[%s2077_s1 + $0x1f8] sm:$0xff] }
 0x5d8   :  { %597 = vrot.lane.b32.xlu1 %v595_v16, %s1526_s0  ;;  %585 = vrot.lane.b32.xlu0 %v583_v19, %s1526_s0  ;;  %v571_v21 = vrot.slane %v1838_v20, 1  ;;  %v1399_v32 = vpack.c.bf16 %v1078_v7, %v1077_v28  ;;  %v570_v40 = vrot.slane %v568_v29, 1  ;;  %v579_v44 = vsel %vm60_vm4, %v568_v29, 0.0  ;;  %v1091_v13 = vld [vmem:[%s2077_s1 + $0x170] sm:$0xff]  ;;  %v1092_v15 = vld [vmem:[%s2077_s1 + $0x178] sm:$0xff] }
 0x5d9   :  { %v1423_v10 = vpack.c.bf16 %v1090_v5, %v1089_v2  ;;  %v1425_v14 = vpack.c.bf16 %v1108_v12, %v1107_v11  ;;  %v1427_v16 = vpack.c.bf16 %v1092_v15, %v1091_v13  ;;  %v580_v17 = vsel %vm61_vm11, %v1838_v20, 0.0  ;;  %v1130_v2 = vld [vmem:[%s2078_s2 + $0xd8] sm:$0xff]  ;;  %v1132_v11 = vld [vmem:[%s2078_s2 + $0xe8] sm:$0xff] }
 0x5da   :  { %v1844_v24 = vsel %vm80_vm1, %v571_v21, %v573_v23  ;;  %1400 = vmatpush3.bf16.msra.mxu0 %v1399_v32  ;;  %v572_v46 = vsel %vm80_vm1, %v570_v40, %v571_v21  ;;  %v1449_v5 = vpack.c.bf16 %v1130_v2, %v1129_v63 }
 0x5db   :  { %1402 = vmatprep.subr.bf16.mxu0 %v1401_v37  ;;  %v577_v50 = vsel %vm58_vm5, %v572_v46, 0.0  ;;  %v578_v31 = vsel %vm59_vm10, %v1844_v24, 0.0  ;;  %v1115_v46 = vld [vmem:[%s2078_s2 + $0x90] sm:$0xff] }
 0x5dc   :  { %599 = vrot.lane.b32.xlu1 %v596_v25, %s1526_s0  ;;  %587 = vrot.lane.b32.xlu0 %v584_v26, %s1526_s0  ;;  %v1113_v25 = vld [vmem:[%s2078_s2 + $0x80] sm:$0xff]  ;;  %v1114_v26 = vld [vmem:[%s2078_s2 + $0x88] sm:$0xff] }
 0x5dd   :  { %v1429_v9 = vpack.c.bf16 %v1114_v26, %v1113_v25 }
 0x5de   :  { %1404 = vmatpush3.bf16.msra.mxu0 %v1403_v41 }
 0x5df   :  { %1406 = vmatprep.subr.bf16.mxu0 %v1405_v35  ;;  %1430 = vmatprep.subr.bf16.mxu1 %v1429_v9 }
 0x5e0   :  { %623 = vrot.lane.b32.xlu1 %v1821_v3, %s1526_s0  ;;  %621 = vrot.lane.b32.xlu0 %v1823_v6, %s1526_s0 }
 0x5e1   :  { %1432 = vmatpush3.bf16.msra.mxu1 %v1429_v9 }
 0x5e2   :  { %1408 = vmatpush3.bf16.msra.mxu0 %v1407_v47  ;;  %v1116_v47 = vld [vmem:[%s2078_s2 + $0x98] sm:$0xff] }
 0x5e3   :  { %1410 = vmatprep.subr.bf16.mxu0 %v1409_v48  ;;  %v1433_v48 = vpack.c.bf16 %v1116_v47, %v1115_v46 }
 0x5e4   :  { %615 = vrot.lane.b32.xlu0 %v579_v44, %s1527_s23 }
 0x5e5   :  { %1434 = vmatprep.subr.bf16.mxu1 %v1433_v48 }
 0x5e6   :  { %1412 = vmatpush3.bf16.msra.mxu0 %v1411_v53  ;;  %1436 = vmatpush3.bf16.msra.mxu1 %v1433_v48  ;;  %v1441_v53 = vpack.c.bf16 %v1120_v52, %v1119_v51 }
 0x5e7   :  { %1414 = vmatprep.subr.bf16.mxu0 %v1413_v54 }
 0x5e8   :  { %607 = vrot.lane.b32.xlu0 %v577_v50, %s1524_s17  ;;  %v1437_v50 = vpack.c.bf16 %v1118_v49, %v1117_v4 }
 0x5ea   :  { %1416 = vmatpush3.bf16.msra.mxu0 %v1415_v58  ;;  %1438 = vmatprep.subr.bf16.mxu1 %v1437_v50 }
 0x5eb   :  { %1418 = vmatprep.subr.bf16.mxu0 %v1417_v59  ;;  %1440 = vmatpush3.bf16.msra.mxu1 %v1437_v50 }
 0x5ec   :  { %1442 = vmatprep.subr.bf16.mxu1 %v1441_v53 }
 0x5ee   :  { %1420 = vmatpush3.bf16.msra.mxu0 %v1419_v0  ;;  %v1122_v0 = vld [vmem:[%s2079_s3 + $0x2] ss:$0 sm:$0xff] }
 0x5ef   :  { %1422 = vmatprep.subr.bf16.mxu0 %v1421_v1  ;;  %1444 = vmatpush3.bf16.msra.mxu1 %v1441_v53  ;;  %v1445_v1 = vpack.c.bf16 %v1128_v62, %v1127_v61 }
 0x5f1   :  { %1446 = vmatprep.subr.bf16.mxu1 %v1445_v1 }
 0x5f2   :  { %1424 = vmatpush3.bf16.msra.mxu0 %v1423_v10  ;;  %v1131_v10 = vld [vmem:[%s2078_s2 + $0xe0] sm:$0xff] }
 0x5f3   :  { %1426 = vmatprep.subr.bf16.mxu0 %v1425_v14 }
 0x5f6   :  { %1428 = vmatpush3.bf16.msra.mxu0 %v1427_v16  ;;  %v1453_v16 = vpack.c.bf16 %v1132_v11, %v1131_v10 }
 0x64a   :  { %v598_v19 = vpop.permute.xlu1 %597  ;;  %v586_v21 = vpop.permute.xlu0 %585 }
 0x64b   :  { %v591_v23 = vsel %vm62_vm7, %v586_v21, 0.0  ;;  %v603_v29 = vsel %vm64_vm8, %v598_v19, 0.0 }
 0x64c   :  { %629 = vrot.lane.b32.xlu1 %v591_v23, %s1524_s17 }
 0x64e   :  { %v588_v27 = vpop.permute.xlu0 %587  ;;  %v600_v28 = vpop.permute.xlu1 %599 }
 0x64f   :  { %v592_v30 = vsel %vm63_vm6, %v588_v27, 0.0  ;;  %v604_v7 = vsel %vm65_vm9, %v600_v28, 0.0 }
 0x650   :  { %637 = vrot.lane.b32.xlu1 %v603_v29, %s1527_s23  ;;  %631 = vrot.lane.b32.xlu0 %v592_v30, %s1524_s17 }
 0x652   :  { %v622_v32 = vpop.permute.xlu0 %621  ;;  %v624_v34 = vpop.permute.xlu1 %623 }
 0x654   :  { %609 = vrot.lane.b32.xlu1 %v578_v31, %s1524_s17  ;;  %639 = vrot.lane.b32.xlu0 %v604_v7, %s1527_s23  ;;  %v1133_v7 = vld [vmem:[%s2078_s2 + $0xf0] sm:$0xff]  ;;  %v1134_v31 = vld [vmem:[%s2078_s2 + $0xf8] sm:$0xff] }
 0x656   :  { %v616_v33 = vpop.permute.xlu0 %615 }
 0x658   :  { %617 = vrot.lane.b32.xlu1 %v580_v17, %s1527_s23  ;;  %v1457_v17 = vpack.c.bf16 %v1134_v31, %v1133_v7 }
 0x65a   :  { %v608_v36 = vpop.permute.xlu0 %607 }
 0x65b   :  { %v643_v38 = vsel %vm28_vm0, %v1823_v6, %v608_v36 }
 0x65c   :  { %v645_v35 = vsel %vm172_vm12, %v643_v38, %v616_v33 }
 0x6be   :  { %v630_v37 = vpop.permute.xlu1 %629 }
 0x6bf   :  { %v649_v24 = vsel %vm28_vm0, %v622_v32, %v630_v37 }
 0x6c2   :  { %v638_v39 = vpop.permute.xlu1 %637  ;;  %v632_v40 = vpop.permute.xlu0 %631 }
 0x6c3   :  { %v651_v41 = vsel %vm172_vm12, %v649_v24, %v638_v39  ;;  %v650_v22 = vsel %vm28_vm0, %v624_v34, %v632_v40 }
 0x6c4   :  { %1109 = vmatprep.mubr.msk.f32.mxu0 %vm175_vm13, %v651_v41 }
 0x6c5   :  { %1110 = vmatmul.mubr.msk.f32.vlgmr.msra.gmra.mrb[4].mxu0 %vm175_vm13, %v645_v35  ;;  %v1136_v35 = vld [vmem:[%s2079_s3 + $0x3] ss:$0 sm:$0xff]  ;;  %s1528_s3 = smov [#allocation2]  }
 0x6c6   :  { %v610_v20 = vpop.permute.xlu1 %609  ;;  %v640_v42 = vpop.permute.xlu0 %639  ;;  %s1043_s19 = sshll.u32 %s1528_s3, 4  ;;  %s1044_s19 = int_to_ptr.vmem [resolvable:$true] %s1043_s19 }
 0x6c7   :  { %v652_v43 = vsel %vm172_vm12, %v650_v22, %v640_v42  ;;  %v644_v44 = vsel %vm28_vm0, %v1821_v3, %v610_v20  ;;  %s1500_s20 = scalar_lea.vmem %s1044_s19, 512  ;;  %p1505_p1 = scmp.lt.s32.totalorder %s1044_s19, %s1044_s19 }
 0x6c8   :  { %1111 = vmatprep.mubr.msk.f32.mxu0 %vm175_vm13, %v652_v43  ;;  %p1501_p0 = scmp.ne.s32.totalorder %s1044_s19, %s1500_s20  ;;  %p1506_p2 = scmp.lt.s32.totalorder %s1500_s20, %s1500_s20 }
 0x6ca   :  { %v618_v45 = vpop.permute.xlu1 %617  ;;  %p1507_p3 = por %p1506_p2, %p1505_p1 }
 0x6cb   :  { %v646_v18 = vsel %vm172_vm12, %v644_v44, %v618_v45 }
 0x6cc   :  { %1112 = vmatmul.mubr.msk.f32.gmra.mrb[6].mxu0 %vm175_vm13, %v646_v18  ;;  %p1508_p4 = pnand %p1507_p3, %p1501_p0 }
 0x798   :  { %v1231_v54 = vpop.f32.mrb[4].mxu0 }
 0x799   :  { %v1232_v8 = vpop.f32.mrb[5].mxu0 }
 0x79a   :  { %v1233_v55 = vadd.f32 %v1232_v8, %v1231_v54 }
 0x79c   :  { %v763_v56 = vmax.f32 %v1233_v55, 0.0 }
 0x79e   :  { %1311 = vmatprep.mubr.msk.f32.mxu1 %vm172_vm12, %v763_v56 }
 0x79f   :  { %v1234_v57 = vpop.f32.mrb[6].mxu0 }
 0x7a0   :  { %v1235_v58 = vpop.f32.mrb[7].mxu0 }
 0x7a1   :  { %v1236_v59 = vadd.f32 %v1235_v58, %v1234_v57 }
 0x7a3   :  { %v764_v60 = vmax.f32 %v1236_v59, 0.0 }
 0x7a5   :  { %1312 = vmatmul.mubr.msk.f32.vlgmr.msra.gmra.mrb[4].mxu1 %vm172_vm12, %v764_v60 }
 0x7a6   :  { %1448 = vmatpush3.bf16.msra.mxu1 %v1445_v1 }
 0x7a7   :  { %1450 = vmatprep.subr.bf16.mxu1 %v1449_v5 }
 0x7aa   :  { %1452 = vmatpush3.bf16.msra.mxu1 %v1449_v5 }
 0x7ab   :  { %1454 = vmatprep.subr.bf16.mxu1 %v1453_v16 }
 0x7ae   :  { %1456 = vmatpush3.bf16.msra.mxu1 %v1453_v16 }
 0x7af   :  { %1458 = vmatprep.subr.bf16.mxu1 %v1457_v17 }
 0x7b2   :  { %1460 = vmatpush3.bf16.msra.mxu1 %v1457_v17 }
 0x878   :  { %v1313_v12 = vpop.f32.mrb[4].mxu1 }
 0x879   :  { %v860_v13 = vadd.f32 %v1313_v12, %v1122_v0  ;;  %v854_v14 = vpop.f32.mrb[5].mxu1 }
 0x87a   :  { %v855_v15 = vadd.f32 %v1122_v0, %v854_v14 }
 0x87b   :  { %v864_v19 = vmax.f32 %v860_v13, 0.0  ;;  %v1126_v26 = vmul.f32 -1.442695, %v860_v13 }
 0x87c   :  { %v863_v21 = vmax.f32 %v855_v15, 0.0  ;;  %v1125_v9 = vmul.f32 -1.442695, %v855_v15 }
 0x87d   :  { %v878_v23 = vsub.f32 %v764_v60, %v864_v19  ;;  %1484 = vpow2.f32 %v1126_v26 }
 0x87e   :  { %v877_v25 = vsub.f32 %v763_v56, %v863_v21  ;;  %1486 = vpow2.f32 %v1125_v9 }
 0x87f   :  { %883 = vrot.lane.b32.xlu1 %v878_v23, %s1527_s23 }
 0x880   :  { %881 = vrot.lane.b32.xlu0 %v877_v25, %s1527_s23 }
 0x887   :  { %v1485_v27 = vpop.eup %1484 }
 0x888   :  { %v1487_v29 = vpop.eup %1486  ;;  %v872_v30 = vadd.f32 1.0, %v1485_v27 }
 0x889   :  { %v871_v28 = vadd.f32 1.0, %v1487_v29 }
 0x88a   :  { %1488 = vrcp.f32 %v872_v30 }
 0x88b   :  { %1490 = vrcp.f32 %v871_v28 }
 0x894   :  { %v1489_v32 = vpop.eup %1488 }
 0x895   :  { %v1491_v34 = vpop.eup %1490 }
 0x8f1   :  { %v884_v33 = vpop.permute.xlu1 %883 }
 0x8f2   :  { %v888_v36 = vmul.f32 %v1489_v32, %v884_v33  ;;  %v882_v37 = vpop.permute.xlu0 %881 }
 0x8f3   :  { %v887_v38 = vmul.f32 %v1491_v34, %v882_v37 }
 0x8f4   :  { %893 = vrot.lane.b32.xlu1 %v888_v36, %s1527_s23 }
 0x8f5   :  { %891 = vrot.lane.b32.xlu0 %v887_v38, %s1527_s23 }
 0x966   :  { %v894_v24 = vpop.permute.xlu1 %893 }
 0x967   :  { %v892_v39 = vpop.permute.xlu0 %891  ;;  %v898_v41 = vadd.f32 %v894_v24, %v864_v19 }
 0x968   :  { %v897_v40 = vadd.f32 %v892_v39, %v863_v21 }
 0x96a   :  { %1330 = vmatprep.mubr.msk.f32.mxu1 %vm172_vm12, %v897_v40 }
 0x96b   :  { %1331 = vmatmul.mubr.msk.f32.vlgmr.msra.gmra.mrb[6].mxu1 %vm172_vm12, %v898_v41 }
 0xa3e   :  { %v1332_v22 = vpop.f32.mrb[6].mxu1 }
 0xa3f   :  { %v994_v20 = vadd.f32 %v1332_v22, %v1136_v35  ;;  %v988_v42 = vpop.f32.mrb[7].mxu1 }
 0xa40   :  { %v989_v43 = vadd.f32 %v1136_v35, %v988_v42 }
 0xa41   :  { %v998_v44 = vmax.f32 %v994_v20, 0.0  ;;  %v1140_v47 = vmul.f32 -1.442695, %v994_v20 }
 0xa42   :  { %v997_v45 = vmax.f32 %v989_v43, 0.0  ;;  %v1139_v48 = vmul.f32 -1.442695, %v989_v43 }
 0xa43   :  { %v1012_v18 = vsub.f32 %v898_v41, %v998_v44  ;;  %1492 = vpow2.f32 %v1140_v47 }
 0xa44   :  { %v1011_v46 = vsub.f32 %v897_v40, %v997_v45  ;;  %1494 = vpow2.f32 %v1139_v48 }
 0xa45   :  { %1017 = vrot.lane.b32.xlu1 %v1012_v18, %s1527_s23 }
 0xa46   :  { %1015 = vrot.lane.b32.xlu0 %v1011_v46, %s1527_s23 }
 0xa4d   :  { %v1493_v4 = vpop.eup %1492 }
 0xa4e   :  { %v1495_v49 = vpop.eup %1494  ;;  %v1006_v50 = vadd.f32 1.0, %v1493_v4 }
 0xa4f   :  { %v1005_v51 = vadd.f32 1.0, %v1495_v49 }
 0xa50   :  { %1496 = vrcp.f32 %v1006_v50 }
 0xa51   :  { %1498 = vrcp.f32 %v1005_v51 }
 0xa5a   :  { %v1497_v52 = vpop.eup %1496 }
 0xa5b   :  { %v1499_v54 = vpop.eup %1498 }
 0xab7   :  { %v1018_v53 = vpop.permute.xlu1 %1017 }
 0xab8   :  { %v1022_v8 = vmul.f32 %v1497_v52, %v1018_v53  ;;  %v1016_v55 = vpop.permute.xlu0 %1015 }
 0xab9   :  { %v1021_v56 = vmul.f32 %v1499_v54, %v1016_v55 }
 0xaba   :  { %1027 = vrot.lane.b32.xlu1 %v1022_v8, %s1527_s23 }
 0xabb   :  { %1025 = vrot.lane.b32.xlu0 %v1021_v56, %s1527_s23 }
 0xb2c   :  { %v1028_v57 = vpop.permute.xlu1 %1027 }
 0xb2d   :  { %v1032_v58 = vadd.f32 %v1028_v57, %v998_v44  ;;  %v1026_v59 = vpop.permute.xlu0 %1025 }
 0xb2e   :  { %v1031_v60 = vadd.f32 %v1026_v59, %v997_v45 }
 0xb2f   :  { %v1034_v61 = vadd.f32 %v1032_v58, %v1821_v3 }
 0xb30   :  { %v1033_v62 = vadd.f32 %v1031_v60, %v1823_v6 }
 0xb31   :  { %1037 = vst.msk [vmem:[#allocation2 + $0x18] sm:$0xff] %vm172_vm12, %v1034_v61 }
 0xb32   :  { %1036 = vst.msk [vmem:[#allocation2 + $0x10] sm:$0xff] %vm172_vm12, %v1033_v62 }
 0xb33   :  { %1511 = shalt.err (!%p1508_p4)
}
 0xb34   :  { %s1512_s22 = scalar_lea.hbm %s2080_s4, 512 }
 0xb35   :  { %p1513_p5 = scmp.ne.s32.totalorder %s2080_s4, %s1512_s22  ;;  %p1516_p6 = scmp.lt.u32.totalorder %s1512_s22, %s2080_s4 }
 0xb37   :  { %p1518_p7 = pnand %p1516_p6, %p1513_p5 }
 0xb39   :  { %1521 = shalt.err (!%p1518_p7)
}
 0xb3a   :  { %s1529_s27 = smov 128   ;;  %s1530_s28 = smov 8  }
 0xb3b   :  { %1049 = dma.vmem_to_hbm [thread:$0]  %s1044_s19, 512, %s2080_s4, [#allocation3], %s1529_s27, %s1529_s27, %s1530_s28  }
 0xb3c   :  { %1522 = dma.done.wait [#allocation3], 512  }
 0xb3d   :  { %1523 = vsyncadd [#allocation3], 4294966784 }
 0xb3e   :  { %1053 = vsyncpa [#allocation3], 1 }

</bundles_post_ra>
